<compile_context>
chip_gen: v7x
topology: tpu7x:2x2x1
jax: 0.10.0
libtpu: 0.0.40
codegen_flags: <defaults>
</compile_context>

<pallas_src>
import functools
import math

import jax
import jax.numpy as jnp
from jax.experimental import pallas as pl
from jax.experimental.pallas import tpu as pltpu


def _round_up(x, m):
    return (x + m - 1) // m * m


# ---------------------------------------------------------------------------
# One-time capability / hardware queries (cached at module level)
# ---------------------------------------------------------------------------
_BUFFERED1_SUPPORTED = None


def _buffered_one_supported():
    """Probe pl.Buffered(1) (single-buffered resident weights) exactly once."""
    global _BUFFERED1_SUPPORTED
    if _BUFFERED1_SUPPORTED is None:
        try:
            def _probe(x_ref, w_ref, o_ref):
                o_ref[...] = x_ref[...] + w_ref[...]

            out = pl.pallas_call(
                _probe,
                out_shape=jax.ShapeDtypeStruct((16, 128), jnp.float32),
                grid=(2,),
                in_specs=[
                    pl.BlockSpec((8, 128), lambda i: (i, 0)),
                    pl.BlockSpec((8, 128), lambda i: (0, 0),
                                 pipeline_mode=pl.Buffered(1)),
                ],
                out_specs=pl.BlockSpec((8, 128), lambda i: (i, 0)),
            )(jnp.zeros((16, 128), jnp.float32), jnp.ones((8, 128), jnp.float32))
            jax.block_until_ready(out)
            _BUFFERED1_SUPPORTED = True
        except Exception:
            _BUFFERED1_SUPPORTED = False
    return _BUFFERED1_SUPPORTED


def _vmem_budget():
    """~75% of physical VMEM (96 MiB on v5e/v6e, 48 MiB on v7x), leaving headroom."""
    try:
        cap = int(pltpu.get_tpu_info().vmem_capacity_bytes)
    except Exception:
        cap = 128 << 20
    return max(32 << 20, (cap * 3) // 4)


# ---------------------------------------------------------------------------
# Kernel
# ---------------------------------------------------------------------------
def _norm(x, true_d, eps):
    """LayerNorm without the affine part (gamma/beta folded into the next matmul).

    Two-pass variance; lanes >= true_d (zero padding) are masked out so the
    statistics equal an unpadded LayerNorm's.
    """
    d_pad = x.shape[-1]
    inv_d = 1.0 / true_d
    mu = jnp.sum(x, axis=-1, keepdims=True) * inv_d
    centered = x - mu
    if d_pad != true_d:
        lane = jax.lax.broadcasted_iota(jnp.int32, (1, d_pad), 1)
        centered = jnp.where(lane < true_d, centered, 0.0)
    var = jnp.sum(centered * centered, axis=-1, keepdims=True) * inv_d
    return centered * jax.lax.rsqrt(var + eps)


def _gelu(h, approx):
    if approx:
        # tanh approximation -> EUP; small (~1e-3) deviation from torch's exact erf GELU.
        c = math.sqrt(2.0 / math.pi)
        return 0.5 * h * (1.0 + jnp.tanh(c * (h + 0.044715 * (h * h * h))))
    return 0.5 * h * (1.0 + jax.lax.erf(h * (1.0 / math.sqrt(2.0))))


def swin_block_kernel(x_ref,
                      wa_ref, ba_ref,
                      w1_ref, b1_ref,
                      w2_ref, b2_ref,
                      o_ref,
                      *, true_d, eps, approx_gelu):
    x = x_ref[...].astype(jnp.float32)
    cdt = wa_ref.dtype            # MXU operand dtype (bf16 by default)

    # ---- Residual(PreNorm(emptyWSA)):  x += LN(x) @ Wa + ba ----
    xn = _norm(x, true_d, eps)
    attn = jnp.dot(xn.astype(cdt), wa_ref[...],
                   preferred_element_type=jnp.float32)
    x = x + attn + ba_ref[...]

    # ---- Residual(PreNorm(FeedForward)):  x += GELU(LN(x) @ W1 + b1) @ W2 + b2 ----
    xn2 = _norm(x, true_d, eps)
    h = jnp.dot(xn2.astype(cdt), w1_ref[...],
                preferred_element_type=jnp.float32) + b1_ref[...]
    h = _gelu(h, approx_gelu)
    ff = jnp.dot(h.astype(cdt), w2_ref[...],
                 preferred_element_type=jnp.float32) + b2_ref[...]

    o_ref[...] = (x + ff).astype(o_ref.dtype)


# ---------------------------------------------------------------------------
# pallas_call wrapper
# ---------------------------------------------------------------------------
def _const_spec(shape, single_buffer):
    index_map = lambda i: (0, 0)
    if single_buffer:
        # Constant index_map => DMA'd once; Buffered(1) frees the second VMEM copy.
        return pl.BlockSpec(shape, index_map, pipeline_mode=pl.Buffered(1))
    return pl.BlockSpec(shape, index_map)


def _pallas_forward(xf, wa, ba, w1, b1, w2, b2, *,
                    row_tile, true_d, eps, approx_gelu,
                    single_buffer_weights, alias_input, vmem_limit):
    rows_p, d_pad = xf.shape
    h_pad = w1.shape[1]
    grid = (rows_p // row_tile,)

    kernel = functools.partial(swin_block_kernel, true_d=true_d, eps=eps,
                               approx_gelu=approx_gelu)

    act_bytes = jnp.dtype(xf.dtype).itemsize
    wbytes = jnp.dtype(wa.dtype).itemsize
    weight_bytes = (d_pad * d_pad + 2 * d_pad * h_pad) * wbytes + (2 * d_pad + h_pad) * 4
    io_bytes = 2 * rows_p * d_pad * act_bytes
    cost = pl.CostEstimate(
        flops=2 * rows_p * (d_pad * d_pad + 2 * d_pad * h_pad),
        transcendentals=rows_p * h_pad,
        bytes_accessed=io_bytes + weight_bytes,
    )

    return pl.pallas_call(
        kernel,
        out_shape=jax.ShapeDtypeStruct((rows_p, d_pad), xf.dtype),
        grid_spec=pltpu.PrefetchScalarGridSpec(
            num_scalar_prefetch=0,
            grid=grid,
            in_specs=[
                pl.BlockSpec((row_tile, d_pad), lambda i: (i, 0)),      # x rows
                _const_spec((d_pad, d_pad), single_buffer_weights),     # Wa (gamma1 folded)
                _const_spec((1, d_pad), single_buffer_weights),         # ba (beta1 folded)
                _const_spec((d_pad, h_pad), single_buffer_weights),     # W1 (gamma2 folded)
                _const_spec((1, h_pad), single_buffer_weights),         # b1 (beta2 folded)
                _const_spec((h_pad, d_pad), single_buffer_weights),     # W2
                _const_spec((1, d_pad), single_buffer_weights),         # b2
            ],
            out_specs=pl.BlockSpec((row_tile, d_pad), lambda i: (i, 0)),
        ),
        input_output_aliases=({0: 0} if alias_input else {}),
        cost_estimate=cost,
        compiler_params=pltpu.CompilerParams(
            dimension_semantics=("parallel",),
            vmem_limit_bytes=vmem_limit,
        ),
    )(xf, wa, ba, w1, b1, w2, b2)


# ---------------------------------------------------------------------------
# One-time parameter preparation (fold LN affine, pad lane-dense, cast weights)
# ---------------------------------------------------------------------------
def prepare_params(params, *, weight_dtype=jnp.bfloat16):
    """Fold LayerNorm affine into the following matmuls, pad to lane-dense shapes,
    and cast weights to the MXU operand dtype.  Call once; reuse the result."""
    f32 = jnp.float32
    g1 = params["g1"].reshape(-1).astype(f32)
    be1 = params["be1"].reshape(-1).astype(f32)
    g2 = params["g2"].reshape(-1).astype(f32)
    be2 = params["be2"].reshape(-1).astype(f32)
    wa = params["wa_T"].astype(f32)
    ba = params["ba"].reshape(-1).astype(f32)
    w1 = params["w1"].astype(f32)
    b1 = params["b1"].reshape(-1).astype(f32)
    w2 = params["w2"].astype(f32)
    b2 = params["b2"].reshape(-1).astype(f32)

    D, H = w1.shape
    d_pad = _round_up(D, 128)          # lane-dense channel dim
    h_pad = _round_up(H, 128)          # lane-dense hidden dim

    # Fold LayerNorm affine into the next matmul (exact):
    #   (xn*g + be) @ W + b  ==  xn @ (diag(g) @ W) + (be @ W + b)
    wa_eff = g1[:, None] * wa
    ba_eff = be1 @ wa + ba
    w1_eff = g2[:, None] * w1
    b1_eff = be2 @ w1 + b1

    def pad2(m, r, c):
        return jnp.pad(m, ((0, r - m.shape[0]), (0, c - m.shape[1])))

    return {
        "_prepared": True,
        "dim": D, "hidden": H, "d_pad": d_pad, "h_pad": h_pad,
        "weight_dtype": jnp.dtype(weight_dtype),
        "wa": pad2(wa_eff, d_pad, d_pad).astype(weight_dtype),
        "ba": jnp.pad(ba_eff, (0, d_pad - D)).reshape(1, d_pad).astype(f32),
        "w1": pad2(w1_eff, d_pad, h_pad).astype(weight_dtype),
        "b1": jnp.pad(b1_eff, (0, h_pad - H)).reshape(1, h_pad).astype(f32),
        "w2": pad2(w2, h_pad, d_pad).astype(weight_dtype),
        "b2": jnp.pad(b2, (0, d_pad - D)).reshape(1, d_pad).astype(f32),
    }


def empty_point_swin_block(x, params, *, row_tile=512, weight_dtype=jnp.bfloat16,
                           act_dtype=None, approx_gelu=True, eps=1e-5):
    """x: (B, N, D) channel-last. Returns (B, N, D). `params` may be raw (as produced
    by init_params) or already prepared via prepare_params (preferred on hot paths)."""
    if not (isinstance(params, dict) and params.get("_prepared", False)):
        params = prepare_params(params, weight_dtype=weight_dtype)

    B, N, D = x.shape
    assert D == params["dim"], "channel dim mismatch with prepared params"
    H = params["hidden"]
    d_pad, h_pad = params["d_pad"], params["h_pad"]
    rows = B * N

    # Activation streaming dtype: bf16 when the weights are 16-bit (halves x/out DMA),
    # otherwise the caller's dtype.  LN/residual math is f32 inside the kernel.
    if act_dtype is None:
        act_dtype = (jnp.bfloat16 if jnp.dtype(params["weight_dtype"]).itemsize <= 2
                     else x.dtype)
    act_dtype = jnp.dtype(act_dtype)

    single_buf = _buffered_one_supported()
    vmem_cap = _vmem_budget()
    act_bytes = act_dtype.itemsize
    wbytes = jnp.dtype(params["weight_dtype"]).itemsize
    weight_bytes = (d_pad * d_pad + 2 * d_pad * h_pad) * wbytes + (2 * d_pad + h_pad) * 4
    wcopies = 1 if single_buf else 2

    # MXU-friendly row tile (sublane-aligned), never larger than needed.
    row_tile = max(8, min(_round_up(int(row_tile), 8), _round_up(rows, 8)))
    # Guarantee >= 2 grid steps when rows allow so both v7x TensorCores get work.
    while pl.cdiv(rows, row_tile) < 2 and row_tile > 8:
        row_tile = max(8, _round_up(row_tile // 2, 8))

    def _vmem_need(rt):
        act_io = 2 * 2 * rt * d_pad * act_bytes            # double-buffered x/out tiles
        tmp = rt * (5 * d_pad * 4 + h_pad * (4 + wbytes))  # f32 temporaries + cast h
        return act_io + wcopies * weight_bytes + tmp

    # Shrink row tile until the working set fits the VMEM budget (v7x has only 64 MiB).
    while _vmem_need(row_tile) > vmem_cap and row_tile > 8:
        row_tile = max(8, _round_up(row_tile // 2, 8))

    rows_p = _round_up(rows, row_tile)
    vmem_limit = int(min(vmem_cap, max(32 << 20, _vmem_need(row_tile) + (8 << 20))))

    # Prepare the activation slab; only alias the output onto it when it is a fresh
    # temporary (never donate/overwrite the caller's original x buffer).
    xf = x.reshape(rows, D)
    fresh = False
    if xf.dtype != act_dtype:
        xf = xf.astype(act_dtype)
        fresh = True
    if rows_p != rows or d_pad != D:
        xf = jnp.pad(xf, ((0, rows_p - rows), (0, d_pad - D)))
        fresh = True

    out = _pallas_forward(
        xf, params["wa"], params["ba"], params["w1"], params["b1"],
        params["w2"], params["b2"],
        row_tile=row_tile, true_d=D, eps=eps, approx_gelu=approx_gelu,
        single_buffer_weights=single_buf, alias_input=fresh, vmem_limit=vmem_limit)

    return out[:rows, :D].reshape(B, N, D).astype(x.dtype)


# ---------------------------------------------------------------------------
# Test harness
# ---------------------------------------------------------------------------
def init_params(key, dim, mlp_dim):
    ks = jax.random.split(key, 10)

    def uinit(k, shape, fan_in):
        bound = 1.0 / math.sqrt(fan_in)
        return jax.random.uniform(k, shape, jnp.float32, -bound, bound)

    return {
        # LayerNorm 1 (PreNorm of the empty-attention block); randomized to exercise folding
        "g1": 1.0 + 0.1 * jax.random.normal(ks[6], (1, dim), jnp.float32),
        "be1": 0.1 * jax.random.normal(ks[7], (1, dim), jnp.float32),
        # emptyWSA: Conv1d(dim, dim, 1); weight stored transposed as (in, out)
        "wa_T": uinit(ks[0], (dim, dim), dim),
        "ba": uinit(ks[1], (1, dim), dim),
        # LayerNorm 2 (PreNorm of the MLP block)
        "g2": 1.0 + 0.1 * jax.random.normal(ks[8], (1, dim), jnp.float32),
        "be2": 0.1 * jax.random.normal(ks[9], (1, dim), jnp.float32),
        # FeedForward: Linear(dim->mlp), GELU, Linear(mlp->dim); stored transposed (in, out)
        "w1": uinit(ks[2], (dim, mlp_dim), dim),
        "b1": uinit(ks[3], (1, mlp_dim), dim),
        "w2": uinit(ks[4], (mlp_dim, dim), mlp_dim),
        "b2": uinit(ks[5], (1, dim), mlp_dim),
    }


def reference(x, p, eps=1e-5):
    """Plain-JAX reference (f32, exact-erf GELU, unfolded LayerNorm)."""
    def ln(t, g, b):
        mu = jnp.mean(t, axis=-1, keepdims=True)
        var = jnp.mean((t - mu) ** 2, axis=-1, keepdims=True)
        return (t - mu) * jax.lax.rsqrt(var + eps) * g + b

    xh = ln(x, p["g1"], p["be1"])
    x = x + (xh @ p["wa_T"] + p["ba"])
    xh2 = ln(x, p["g2"], p["be2"])
    h = xh2 @ p["w1"] + p["b1"]
    h = 0.5 * h * (1.0 + jax.lax.erf(h * (1.0 / math.sqrt(2.0))))
    return x + (h @ p["w2"] + p["b2"])


if __name__ == "__main__":
    key = jax.random.PRNGKey(0)
    kx, kp = jax.random.split(key)

    B, N, dim, mlp_dim = 2, 8, 32, 64   # small (B, seq, dim) point-token shapes
    x = jax.random.normal(kx, (B, N, dim), jnp.float32)
    params = init_params(kp, dim, mlp_dim)

    ref = reference(x, params)

    # 1) Exact-parity path: f32 weights + f32 activations + erf GELU
    #    (matches torch.nn.GELU default).
    prep_f32 = prepare_params(params, weight_dtype=jnp.float32)
    out_exact = empty_point_swin_block(x, prep_f32, approx_gelu=False)
    out_exact = jax.block_until_ready(out_exact)
    assert out_exact.shape == (B, N, dim)
    assert jnp.allclose(out_exact, ref, atol=1e-4, rtol=1e-4), "f32 path mismatch"

    # 2) Default fast path: bf16 weights + bf16 activation streaming + tanh GELU.
    prep_bf16 = prepare_params(params, weight_dtype=jnp.bfloat16)
    out = empty_point_swin_block(x, prep_bf16)
    out = jax.block_until_ready(out)
    assert out.shape == (B, N, dim)
    assert jnp.allclose(out, ref, atol=5e-2, rtol=5e-2), "bf16 path mismatch"

    print("KERNEL_OK")
</pallas_src>

<mosaic_0001>
module attributes {stable_mosaic.version = 11 : i64} {
  func.func @_probe(%arg0: i32, %arg1: memref<8x128xf32, #tpu.memory_space<vmem>>, %arg2: memref<8x128xf32, #tpu.memory_space<vmem>>, %arg3: memref<8x128xf32, #tpu.memory_space<vmem>>) attributes {dimension_semantics = [#tpu.dimension_semantics<arbitrary>], iteration_bounds = array<i64: 2>, scalar_prefetch = 0 : i64, scratch_operands = 0 : i64, tpu.core_type = #tpu.core_type<tc>, window_params = [{transform_indices = @transform_0, window_bounds = array<i64: 8, 128>}, {pipeline_mode = #tpu.pipeline_mode<synchronous>, transform_indices = @transform_1, window_bounds = array<i64: 8, 128>}, {transform_indices = @transform_2, window_bounds = array<i64: 8, 128>}]} {
    %c0 = arith.constant 0 : index
    %c0_0 = arith.constant 0 : index
    %0 = vector.load %arg1[%c0, %c0_0] : memref<8x128xf32, #tpu.memory_space<vmem>>, vector<8x128xf32>
    %c0_1 = arith.constant 0 : index
    %c0_2 = arith.constant 0 : index
    %1 = vector.load %arg2[%c0_1, %c0_2] : memref<8x128xf32, #tpu.memory_space<vmem>>, vector<8x128xf32>
    %2 = arith.addf %0, %1 : vector<8x128xf32>
    %c0_3 = arith.constant 0 : index
    %c0_4 = arith.constant 0 : index
    %3 = vector.load %arg3[%c0_3, %c0_4] : memref<8x128xf32, #tpu.memory_space<vmem>>, vector<8x128xf32>
    tpu.vector_store %arg3[%c0_3, %c0_4], %2 {strides = array<i32>} : memref<8x128xf32, #tpu.memory_space<vmem>>, vector<8x128xf32>,
    return
  }
  func.func @transform_0(%arg0: i32) -> (i32, i32) {
    %c0_i32 = arith.constant 0 : i32
    %c0_i32_0 = arith.constant 0 : i32
    return %arg0, %c0_i32 : i32, i32
  }
  func.func @transform_1(%arg0: i32) -> (i32, i32) {
    %c0_i32 = arith.constant 0 : i32
    %c0_i32_0 = arith.constant 0 : i32
    %c0_i32_1 = arith.constant 0 : i32
    return %c0_i32, %c0_i32_0 : i32, i32
  }
  func.func @transform_2(%arg0: i32) -> (i32, i32) {
    %c0_i32 = arith.constant 0 : i32
    %c0_i32_0 = arith.constant 0 : i32
    return %arg0, %c0_i32 : i32, i32
  }
}

module attributes {stable_mosaic.version = 11 : i64} {
  func.func @swin_block_kernel(%arg0: i32, %arg1: memref<8x128xf32, #tpu.memory_space<vmem>>, %arg2: memref<128x128xf32, #tpu.memory_space<vmem>>, %arg3: memref<1x128xf32, #tpu.memory_space<vmem>>, %arg4: memref<128x128xf32, #tpu.memory_space<vmem>>, %arg5: memref<1x128xf32, #tpu.memory_space<vmem>>, %arg6: memref<128x128xf32, #tpu.memory_space<vmem>>, %arg7: memref<1x128xf32, #tpu.memory_space<vmem>>, %arg8: memref<8x128xf32, #tpu.memory_space<vmem>>) attributes {dimension_semantics = [#tpu.dimension_semantics<parallel>], iteration_bounds = array<i64: 2>, scalar_prefetch = 0 : i64, scratch_operands = 0 : i64, tpu.core_type = #tpu.core_type<tc>, window_params = [{transform_indices = @transform_0, window_bounds = array<i64: 8, 128>}, {pipeline_mode = #tpu.pipeline_mode<synchronous>, transform_indices = @transform_1, window_bounds = array<i64: 128, 128>}, {pipeline_mode = #tpu.pipeline_mode<synchronous>, transform_indices = @transform_2, window_bounds = array<i64: 1, 128>}, {pipeline_mode = #tpu.pipeline_mode<synchronous>, transform_indices = @transform_3, window_bounds = array<i64: 128, 128>}, {pipeline_mode = #tpu.pipeline_mode<synchronous>, transform_indices = @transform_4, window_bounds = array<i64: 1, 128>}, {pipeline_mode = #tpu.pipeline_mode<synchronous>, transform_indices = @transform_5, window_bounds = array<i64: 128, 128>}, {pipeline_mode = #tpu.pipeline_mode<synchronous>, transform_indices = @transform_6, window_bounds = array<i64: 1, 128>}, {transform_indices = @transform_7, window_bounds = array<i64: 8, 128>}]} {
    %c0 = arith.constant 0 : index
    %c0_0 = arith.constant 0 : index
    %0 = vector.load %arg1[%c0, %c0_0] : memref<8x128xf32, #tpu.memory_space<vmem>>, vector<8x128xf32>
    %cst = arith.constant dense<0.000000e+00> : vector<8xf32>
    %1 = vector.multi_reduction <add>, %0, %cst [1] : vector<8x128xf32> to vector<8xf32>
    %2 = vector.shape_cast %1 : vector<8xf32> to vector<8x1xf32>
    %cst_1 = arith.constant 3.125000e-02 : f32
    %3 = vector.broadcast %cst_1 : f32 to vector<8x1xf32>
    %4 = arith.mulf %2, %3 : vector<8x1xf32>
    %5 = vector.broadcast %4 : vector<8x1xf32> to vector<8x128xf32>
    %6 = arith.subf %0, %5 : vector<8x128xf32>
    %7 = tpu.iota {dimensions = array<i32: 1>} : vector<1x128xi32>
    %c32_i32 = arith.constant 32 : i32
    %8 = vector.broadcast %c32_i32 : i32 to vector<1x128xi32>
    %9 = arith.cmpi slt, %7, %8 : vector<1x128xi32>
    %cst_2 = arith.constant 0.000000e+00 : f32
    %10 = vector.shape_cast %9 : vector<1x128xi1> to vector<1x128xi1>
    %11 = vector.broadcast %10 : vector<1x128xi1> to vector<8x128xi1>
    %12 = vector.broadcast %cst_2 : f32 to vector<8x128xf32>
    %13 = arith.select %11, %6, %12 : vector<8x128xi1>, vector<8x128xf32>
    %14 = arith.mulf %13, %13 : vector<8x128xf32>
    %cst_3 = arith.constant dense<0.000000e+00> : vector<8xf32>
    %15 = vector.multi_reduction <add>, %14, %cst_3 [1] : vector<8x128xf32> to vector<8xf32>
    %16 = vector.shape_cast %15 : vector<8xf32> to vector<8x1xf32>
    %cst_4 = arith.constant 3.125000e-02 : f32
    %17 = vector.broadcast %cst_4 : f32 to vector<8x1xf32>
    %18 = arith.mulf %16, %17 : vector<8x1xf32>
    %cst_5 = arith.constant 9.99999974E-6 : f32
    %19 = vector.broadcast %cst_5 : f32 to vector<8x1xf32>
    %20 = arith.addf %18, %19 : vector<8x1xf32>
    %21 = math.rsqrt %20 : vector<8x1xf32>
    %22 = vector.broadcast %21 : vector<8x1xf32> to vector<8x128xf32>
    %23 = arith.mulf %13, %22 : vector<8x128xf32>
    %c0_6 = arith.constant 0 : index
    %c0_7 = arith.constant 0 : index
    %24 = vector.load %arg2[%c0_6, %c0_7] : memref<128x128xf32, #tpu.memory_space<vmem>>, vector<128x128xf32>
    %cst_8 = arith.constant dense<0.000000e+00> : vector<8x128xf32>
    %25 = tpu.matmul %23, %24, %cst_8 {dimension_numbers = #tpu.dot_dimension_numbers<[1], [0], [0], [1], [0, 0, 1, 1], [], []>} : vector<8x128xf32>, vector<128x128xf32>, vector<8x128xf32> -> vector<8x128xf32>
    %26 = arith.addf %0, %25 : vector<8x128xf32>
    %c0_9 = arith.constant 0 : index
    %c0_10 = arith.constant 0 : index
    %27 = vector.load %arg3[%c0_9, %c0_10] : memref<1x128xf32, #tpu.memory_space<vmem>>, vector<1x128xf32>
    %28 = vector.broadcast %27 : vector<1x128xf32> to vector<8x128xf32>
    %29 = arith.addf %26, %28 : vector<8x128xf32>
    %cst_11 = arith.constant dense<0.000000e+00> : vector<8xf32>
    %30 = vector.multi_reduction <add>, %29, %cst_11 [1] : vector<8x128xf32> to vector<8xf32>
    %31 = vector.shape_cast %30 : vector<8xf32> to vector<8x1xf32>
    %cst_12 = arith.constant 3.125000e-02 : f32
    %32 = vector.broadcast %cst_12 : f32 to vector<8x1xf32>
    %33 = arith.mulf %31, %32 : vector<8x1xf32>
    %34 = vector.broadcast %33 : vector<8x1xf32> to vector<8x128xf32>
    %35 = arith.subf %29, %34 : vector<8x128xf32>
    %36 = tpu.iota {dimensions = array<i32: 1>} : vector<1x128xi32>
    %c32_i32_13 = arith.constant 32 : i32
    %37 = vector.broadcast %c32_i32_13 : i32 to vector<1x128xi32>
    %38 = arith.cmpi slt, %36, %37 : vector<1x128xi32>
    %cst_14 = arith.constant 0.000000e+00 : f32
    %39 = vector.shape_cast %38 : vector<1x128xi1> to vector<1x128xi1>
    %40 = vector.broadcast %39 : vector<1x128xi1> to vector<8x128xi1>
    %41 = vector.broadcast %cst_14 : f32 to vector<8x128xf32>
    %42 = arith.select %40, %35, %41 : vector<8x128xi1>, vector<8x128xf32>
    %43 = arith.mulf %42, %42 : vector<8x128xf32>
    %cst_15 = arith.constant dense<0.000000e+00> : vector<8xf32>
    %44 = vector.multi_reduction <add>, %43, %cst_15 [1] : vector<8x128xf32> to vector<8xf32>
    %45 = vector.shape_cast %44 : vector<8xf32> to vector<8x1xf32>
    %cst_16 = arith.constant 3.125000e-02 : f32
    %46 = vector.broadcast %cst_16 : f32 to vector<8x1xf32>
    %47 = arith.mulf %45, %46 : vector<8x1xf32>
    %cst_17 = arith.constant 9.99999974E-6 : f32
    %48 = vector.broadcast %cst_17 : f32 to vector<8x1xf32>
    %49 = arith.addf %47, %48 : vector<8x1xf32>
    %50 = math.rsqrt %49 : vector<8x1xf32>
    %51 = vector.broadcast %50 : vector<8x1xf32> to vector<8x128xf32>
    %52 = arith.mulf %42, %51 : vector<8x128xf32>
    %c0_18 = arith.constant 0 : index
    %c0_19 = arith.constant 0 : index
    %53 = vector.load %arg4[%c0_18, %c0_19] : memref<128x128xf32, #tpu.memory_space<vmem>>, vector<128x128xf32>
    %cst_20 = arith.constant dense<0.000000e+00> : vector<8x128xf32>
    %54 = tpu.matmul %52, %53, %cst_20 {dimension_numbers = #tpu.dot_dimension_numbers<[1], [0], [0], [1], [0, 0, 1, 1], [], []>} : vector<8x128xf32>, vector<128x128xf32>, vector<8x128xf32> -> vector<8x128xf32>
    %c0_21 = arith.constant 0 : index
    %c0_22 = arith.constant 0 : index
    %55 = vector.load %arg5[%c0_21, %c0_22] : memref<1x128xf32, #tpu.memory_space<vmem>>, vector<1x128xf32>
    %56 = vector.broadcast %55 : vector<1x128xf32> to vector<8x128xf32>
    %57 = arith.addf %54, %56 : vector<8x128xf32>
    %cst_23 = arith.constant 5.000000e-01 : f32
    %58 = vector.broadcast %cst_23 : f32 to vector<8x128xf32>
    %59 = arith.mulf %58, %57 : vector<8x128xf32>
    %cst_24 = arith.constant 0.707106769 : f32
    %60 = vector.broadcast %cst_24 : f32 to vector<8x128xf32>
    %61 = arith.mulf %57, %60 : vector<8x128xf32>
    %62 = math.erf %61 : vector<8x128xf32>
    %cst_25 = arith.constant 1.000000e+00 : f32
    %63 = vector.broadcast %cst_25 : f32 to vector<8x128xf32>
    %64 = arith.addf %63, %62 : vector<8x128xf32>
    %65 = arith.mulf %59, %64 : vector<8x128xf32>
    %c0_26 = arith.constant 0 : index
    %c0_27 = arith.constant 0 : index
    %66 = vector.load %arg6[%c0_26, %c0_27] : memref<128x128xf32, #tpu.memory_space<vmem>>, vector<128x128xf32>
    %cst_28 = arith.constant dense<0.000000e+00> : vector<8x128xf32>
    %67 = tpu.matmul %65, %66, %cst_28 {dimension_numbers = #tpu.dot_dimension_numbers<[1], [0], [0], [1], [0, 0, 1, 1], [], []>} : vector<8x128xf32>, vector<128x128xf32>, vector<8x128xf32> -> vector<8x128xf32>
    %c0_29 = arith.constant 0 : index
    %c0_30 = arith.constant 0 : index
    %68 = vector.load %arg7[%c0_29, %c0_30] : memref<1x128xf32, #tpu.memory_space<vmem>>, vector<1x128xf32>
    %69 = vector.broadcast %68 : vector<1x128xf32> to vector<8x128xf32>
    %70 = arith.addf %67, %69 : vector<8x128xf32>
    %71 = arith.addf %29, %70 : vector<8x128xf32>
    %c0_31 = arith.constant 0 : index
    %c0_32 = arith.constant 0 : index
    %72 = vector.load %arg8[%c0_31, %c0_32] : memref<8x128xf32, #tpu.memory_space<vmem>>, vector<8x128xf32>
    tpu.vector_store %arg8[%c0_31, %c0_32], %71 {strides = array<i32>} : memref<8x128xf32, #tpu.memory_space<vmem>>, vector<8x128xf32>,
    return
  }
  func.func @transform_0(%arg0: i32) -> (i32, i32) {
    %c0_i32 = arith.constant 0 : i32
    %c0_i32_0 = arith.constant 0 : i32
    return %arg0, %c0_i32 : i32, i32
  }
  func.func @transform_1(%arg0: i32) -> (i32, i32) {
    %c0_i32 = arith.constant 0 : i32
    %c0_i32_0 = arith.constant 0 : i32
    %c0_i32_1 = arith.constant 0 : i32
    return %c0_i32, %c0_i32_0 : i32, i32
  }
  func.func @transform_2(%arg0: i32) -> (i32, i32) {
    %c0_i32 = arith.constant 0 : i32
    %c0_i32_0 = arith.constant 0 : i32
    %c0_i32_1 = arith.constant 0 : i32
    return %c0_i32, %c0_i32_0 : i32, i32
  }
  func.func @transform_3(%arg0: i32) -> (i32, i32) {
    %c0_i32 = arith.constant 0 : i32
    %c0_i32_0 = arith.constant 0 : i32
    %c0_i32_1 = arith.constant 0 : i32
    return %c0_i32, %c0_i32_0 : i32, i32
  }
  func.func @transform_4(%arg0: i32) -> (i32, i32) {
    %c0_i32 = arith.constant 0 : i32
    %c0_i32_0 = arith.constant 0 : i32
    %c0_i32_1 = arith.constant 0 : i32
    return %c0_i32, %c0_i32_0 : i32, i32
  }
  func.func @transform_5(%arg0: i32) -> (i32, i32) {
    %c0_i32 = arith.constant 0 : i32
    %c0_i32_0 = arith.constant 0 : i32
    %c0_i32_1 = arith.constant 0 : i32
    return %c0_i32, %c0_i32_0 : i32, i32
  }
  func.func @transform_6(%arg0: i32) -> (i32, i32) {
    %c0_i32 = arith.constant 0 : i32
    %c0_i32_0 = arith.constant 0 : i32
    %c0_i32_1 = arith.constant 0 : i32
    return %c0_i32, %c0_i32_0 : i32, i32
  }
  func.func @transform_7(%arg0: i32) -> (i32, i32) {
    %c0_i32 = arith.constant 0 : i32
    %c0_i32_0 = arith.constant 0 : i32
    return %arg0, %c0_i32 : i32, i32
  }
}

</mosaic_0001>

<bundles_post_ra>
// kernel: tpu_custom_call.1
= control target key start
LH: loop header
LB: loop body
LE: loop exit
PB: predicated region body
PF: predicated region fallthrough
CT: control target
= control target key end

     0   :  { %7 = vsyncpa [#allocation3], 0  ;;  %s690_s0 = inlined_call_operand.hbm [shape: f32[16,128], index: 0, kind: input, shape index: {}]   ;;  %s691_s1 = inlined_call_operand.hbm [shape: f32[8,128], index: 1, kind: input, shape index: {}]   ;;  %s692_s2 = inlined_call_operand.hbm [shape: f32[16,128], index: 2, kind: output, shape index: {}]  }
   0x1   :  { %9 = vsyncpa [#allocation3 + $0x1], 0 }
   0x2   :  { %10 = vsyncpa [#allocation6], 0 }
   0x3   :  { %11 = vsyncpa [#allocation4], 0 }
   0x4   :  { %13 = vsyncpa [#allocation4 + $0x1], 0  ;;  %s489_s9 = smov 0   ;;  %s491_s10 = smov 0  }
   0x5   :  { %s493_s11 = smov 0   ;;  %s495_s12 = smov 0  }
   0x6 LB: > { %s510_s13 = sadd.s32 4294967295, %s469_s12   ;;  %s270_s14 = sadd.s32 4294967294, %s469_s12   ;;  %s469_s12 = sphi %s495_s12, %s716_s12   ;;  %s465_s11 = sphi %s493_s11, %s715_s11   ;;  %s461_s10 = sphi %s491_s10, %s714_s10   ;;  %s457_s9 = sphi %s489_s9, %s713_s9  }
   0x7   : > { %p39_p0 = scmp.ne.s32.totalorder %s461_s10, %s457_s9  ;;  %p693_p1 = scmp.eq.s32.totalorder %s510_s13, 0 }
   0x8   : > { %p90_p3 = scmp.eq.s32.totalorder %s270_s14, 1  ;;  %p271_p5 = scmp.ge.s32.totalorder %s469_s12, 1 }
   0x9   : > { %p519_p4 = por %p693_p1, %p39_p0  ;;  %p97_p7 = scmp.lt.s32.totalorder %s469_s12, 3 }
   0xa   : > { %p524_p6 = por %p90_p3, %p39_p0  ;;  %s471_s18 = smov [#allocation5]  }
   0xb   : > { %s696_s15 = scalar_select %p519_p4, 1, 0 }
   0xc   : > { %s697_s16 = scalar_select %p524_p6, 1, 0 }
   0xd   : > { %p529_p8 = pnand %p271_p5, %p97_p7  ;;  %s110_s19 = sshll.u32 %s471_s18, 4  ;;  %s111_s19 = int_to_ptr.vmem [resolvable:$true] %s110_s19 }
   0xe   : > { %s537_s20 = sadd.s32 1, %s469_s12   ;;  %s26_s24 = sadd.s32 1, %s465_s11 }
   0xf   : > { %s698_s17 = scalar_select %p529_p8, 1, 0 }
  0x10   : > { %p292_p10 = pneg %p529_p8  ;;  %s23_s22 = ssub.s32 %s469_s12, %s537_s20 }
  0x11   : > { %p547_p12 = scmp.eq.s32.totalorder %s23_s22, 0  ;;  %s341_s27 = scalar_lea.hbm %s691_s1, 128 }
  0x12   : > { %p541_p11 = pnand %p292_p10, %p693_p1  ;;  %p342_p0 = scmp.ne.s32.totalorder %s691_s1, %s341_s27 }
  0x13   : > { %s700_s23 = scalar_select %p547_p12, 1, 0 }
  0x14   : > { %p343_p3 = pneg %p541_p11  ;;  %p348_p10 = scmp.lt.u32.totalorder %s341_s27, %s691_s1 }
  0x16   : > { %p344_p5 = pnand %p343_p3, %p342_p0 }
  0x18   : > { %p345_p7 = pneg %p344_p5 }
  0x1a   : > { %p350_p9 = pnand %p348_p10, %p345_p7 }
  0x1c   : > { %353 = shalt.err (!%p350_p9)
}
  0x1d   : > { %s354_s4 = scalar_lea.vmem %s111_s19, 128  ;;  %p362_p6 = scmp.lt.s32.totalorder %s111_s19, %s111_s19 }
  0x1e   : > { %p355_p1 = scmp.ne.s32.totalorder %s111_s19, %s354_s4  ;;  %p363_p4 = scmp.lt.s32.totalorder %s354_s4, %s354_s4 }
  0x20   : > { %p357_p2 = pnand %p355_p1, %p343_p3  ;;  %p364_p8 = por %p363_p4, %p362_p6 }
  0x22   : > { %p358_p13 = pneg %p357_p2 }
  0x24   : > { %p365_p12 = pnand %p364_p8, %p358_p13 }
  0x26   : > { %368 = shalt.err (!%p365_p12)
}
  0x27   : > { %295 = dma.hbm_to_vmem [thread:$0]  (!%p541_p11), %s691_s1, 128, %s111_s19, [#allocation6]  }
  0x28   : > { %p701_p1 = scmp.ne.s32.totalorder %s700_s23, 0  ;;  %p34_p2 = scmp.eq.s32.totalorder %s469_s12, 0 }
  0x29   : > { %p702_p4 = scmp.ne.s32.totalorder %s465_s11, %s461_s10  ;;  %p703_p6 = scmp.eq.s32.totalorder %s510_s13, 1 }
  0x2a   : > { %s573_s7 = scalar_select %p701_p1, %s465_s11, %s26_s24  }
  0x2b   : > { %p581_p8 = por %p703_p6, %p702_p4  ;;  %p305_p9 = scmp.lt.s32.totalorder %s469_s12, 2 }
  0x2c   : > { %s121_s14 = sand.u32 1, %s465_s11   ;;  %p705_p12 = pmov %p702_p4 }
  0x2d   : > { %s274_s18 = sshll.u32 %s121_s14, 3  ;;  %s275_s21 = sshll.u32 %s469_s12, 7 }
  0x2e   : > { %p35_p13 = por %p34_p2, %p705_p12  ;;  %s594_s19 = scalar_lea.hbm %s690_s0, %s275_s21 }
  0x2f   : > { %s125_s23 = scalar_lea.vmem [#allocation2], %s274_s18  ;;  %s122_s27 = scalar_lea.sflag [#allocation3], %s121_s14 }
  0x30   : > { %s132_s24 = sshll.u32 %s125_s23, 4  ;;  %p596_p11 = pnand %p305_p9, %p35_p13  ;;  %s600_s24 = int_to_ptr.vmem [resolvable:$true] %s132_s24 }
  0x31   : > { %s369_s28 = scalar_lea.hbm %s594_s19, 128  ;;  %s374_s3 = scalar_lea.hbm %s690_s0, 256 }
  0x32   : > { %p370_p0 = scmp.ne.s32.totalorder %s594_s19, %s369_s28  ;;  %p371_p3 = pneg %p596_p11 }
  0x33   : > { %p375_p10 = scmp.lt.u32.totalorder %s594_s19, %s690_s0  ;;  %p376_p1 = scmp.lt.u32.totalorder %s374_s3, %s369_s28 }
  0x34   : > { %p372_p5 = pnand %p371_p3, %p370_p0  ;;  %p378_p4 = scmp.lt.u32.totalorder %s369_s28, %s594_s19 }
  0x35   : > { %p377_p2 = por %p376_p1, %p375_p10 }
  0x36   : > { %p373_p7 = pneg %p372_p5 }
  0x37   : > { %p379_p6 = por %p378_p4, %p377_p2 }
  0x39   : > { %p380_p9 = pnand %p379_p6, %p373_p7 }
  0x3b   : > { %383 = shalt.err (!%p380_p9)
}
  0x3c   : > { %s384_s6 = scalar_lea.vmem %s600_s24, 128  ;;  %s472_s14 = smov [#allocation2]  }
  0x3d   : > { %p385_p12 = scmp.ne.s32.totalorder %s600_s24, %s384_s6  ;;  %s389_s18 = sshll.u32 %s472_s14, 4  ;;  %s390_s18 = int_to_ptr.vmem [resolvable:$false] %s389_s18 }
  0x3e   : > { %s391_s21 = scalar_lea.vmem %s390_s18, 256  ;;  %p392_p5 = scmp.lt.s32.totalorder %s600_s24, %s390_s18 }
  0x3f   : > { %p387_p13 = pnand %p385_p12, %p371_p3  ;;  %p393_p10 = scmp.lt.s32.totalorder %s391_s21, %s384_s6 }
  0x41   : > { %p388_p0 = pneg %p387_p13  ;;  %p394_p1 = por %p393_p10, %p392_p5 }
  0x43   : > { %p395_p2 = pnand %p394_p1, %p388_p0 }
  0x45   : > { %398 = shalt.err (!%p395_p2)
}
  0x46   : > { %299 = dma.hbm_to_vmem [thread:$0]  (!%p596_p11), %s594_s19, 128, %s600_s24, %s122_s27  }
  0x47   : > { %p707_p7 = scmp.ne.s32.totalorder %s698_s17, 0 }
  0x48   : > { %s630_s22 = sand.u32 (!%p707_p7), 1, %s461_s10   ;;  %p708_p3 = scmp.ne.s32.totalorder (!%p707_p7), %s696_s15, 0 }
  0x49   : > { %141 = sbr.rel (%p707_p7) target bundleno = 109 (0x6d), region = 28  ;;  %s277_s25 = sshll.u32 (!%p707_p7), %s630_s22, 3 }
  0x4a   : > { %s144_s23 = scalar_lea.sflag (!%p707_p7), [#allocation3], %s630_s22  ;;  %s147_s28 = scalar_lea.vmem (!%p707_p7), [#allocation2], %s277_s25 }
  0x50   : > { %444 = dma.done.wait (%p708_p3), %s144_s23, 128  }
  0x51   : > { %446 = vsyncadd (%p708_p3), %s144_s23, 4294967168  ;;  %p709_p4 = scmp.eq.s32.totalorder %s510_s13, 0 }
  0x53   : > { %448 = dma.done.wait (%p709_p4), [#allocation6], 128   ;;  %p710_p11 = pmov %p709_p4 }
  0x54   : > { %s171_s17 = scalar_lea.vmem [#allocation7], %s277_s25  ;;  %s281_s24 = sshll.u32 %s510_s13, 7  ;;  %v172_v0 = vld [vmem:[%s147_s28] sm:$0xff]  ;;  %v173_v1 = vld [vmem:[#allocation5] sm:$0xff] }
  0x55   : > { %450 = vsyncadd (%p710_p11), [#allocation6], 4294967168  ;;  %s190_s19 = sshll.u32 %s171_s17, 4  ;;  %v174_v2 = vadd.f32 %v173_v1, %v172_v0  ;;  %s648_s27 = scalar_lea.hbm %s692_s2, %s281_s24  ;;  %s643_s19 = int_to_ptr.vmem [resolvable:$true] %s190_s19 }
  0x56   : > { %s177_s29 = scalar_lea.sflag [#allocation4], %s630_s22  ;;  %s399_s30 = scalar_lea.vmem %s643_s19, 128 }
  0x57   : > { %175 = vst [vmem:[%s171_s17] sm:$0xff] %v174_v2  ;;  %p400_p6 = scmp.ne.s32.totalorder %s643_s19, %s399_s30  ;;  %s473_s13 = smov [#allocation7]  }
  0x58   : > { %s403_s3 = sshll.u32 %s473_s13, 4  ;;  %s404_s3 = int_to_ptr.vmem [resolvable:$false] %s403_s3 }
  0x59   : > { %p401_p9 = pnand %p400_p6, %p581_p8  ;;  %s405_s4 = scalar_lea.vmem %s404_s3, 256 }
  0x5a   : > { %p406_p13 = scmp.lt.s32.totalorder %s643_s19, %s404_s3  ;;  %p407_p0 = scmp.lt.s32.totalorder %s405_s4, %s399_s30 }
  0x5b   : > { %p402_p12 = pneg %p401_p9 }
  0x5c   : > { %p408_p5 = por %p407_p0, %p406_p13 }
  0x5e   : > { %p409_p10 = pnand %p408_p5, %p402_p12 }
  0x60   : > { %412 = shalt.err (!%p409_p10)
}
  0x61   : > { %s413_s5 = scalar_lea.hbm %s648_s27, 128  ;;  %s417_s18 = scalar_lea.hbm %s692_s2, 256 }
  0x62   : > { %p414_p1 = scmp.ne.s32.totalorder %s648_s27, %s413_s5  ;;  %p418_p3 = scmp.lt.u32.totalorder %s648_s27, %s692_s2 }
  0x63   : > { %p419_p4 = scmp.lt.u32.totalorder %s417_s18, %s413_s5  ;;  %p421_p6 = scmp.lt.u32.totalorder %s413_s5, %s648_s27 }
  0x64   : > { %p415_p2 = pnand %p414_p1, %p581_p8 }
  0x65   : > { %p420_p11 = por %p419_p4, %p418_p3 }
  0x66   : > { %p416_p7 = pneg %p415_p2 }
  0x67   : > { %p422_p9 = por %p421_p6, %p420_p11 }
  0x69   : > { %p423_p12 = pnand %p422_p9, %p416_p7 }
  0x6b   : > { %426 = shalt.err (!%p423_p12)
}
  0x6c   : > { %290 = dma.vmem_to_hbm [thread:$0]  (%p581_p8), %s643_s19, 128, %s648_s27, %s177_s29  }
  0x6d PF: > { %s202_s25 = sand.u32 1, %s457_s9   ;;  %p711_p13 = scmp.ne.s32.totalorder %s697_s16, 0 }
  0x6e   : > { %p712_p0 = scmp.ge.s32.totalorder %s469_s12, 2  ;;  %s203_s23 = scalar_lea.sflag [#allocation4], %s202_s25 }
  0x70   : > { %p301_p5 = pnand %p712_p0, %p711_p13 }
  0x72   : > { %452 = dma.done.wait (!%p301_p5), %s203_s23, 128  }
  0x73   : > { %454 = vsyncadd (!%p301_p5), %s203_s23, 4294967168  ;;  %p16_p10 = scmp.ge.s32.totalorder %s537_s20, 4   ;;  %s713_s9 = smov %s461_s10 }
  0x74   : > { %s714_s10 = smov %s465_s11  ;;  %s715_s11 = smov %s573_s7 }
  0x75   : > { %s716_s12 = smov %s537_s20  ;;  %18 = sbr.rel (!%p16_p10) target bundleno = 6 (0x6), region = 77 }
  0x7c   :  { %208 = vsyncpa [#allocation3], 1 }
  0x7d   :  { %210 = vsyncpa [#allocation3 + $0x1], 1 }
  0x7e   :  { %211 = vsyncpa [#allocation6], 1 }
  0x7f   :  { %212 = vsyncpa [#allocation4], 1 }
  0x80   :  { %214 = vsyncpa [#allocation4 + $0x1], 1 }

// kernel: tpu_custom_call.1
= control target key start
LH: loop header
LB: loop body
LE: loop exit
PB: predicated region body
PF: predicated region fallthrough
CT: control target
= control target key end

     0   :  { %12 = vsyncpa [#allocation3], 0  ;;  %s1666_s0 = inlined_call_operand.hbm [shape: f32[16,128], index: 0, kind: input, shape index: {}, may-alias: {0,7}]   ;;  %s1667_s1 = inlined_call_operand.hbm [shape: f32[128,128], index: 1, kind: input, shape index: {}]   ;;  %s1668_s2 = inlined_call_operand.vmem [shape: f32[1,128], index: 2, kind: input, shape index: {}]   ;;  %s1669_s3 = inlined_call_operand.hbm [shape: f32[128,128], index: 3, kind: input, shape index: {}]   ;;  %s1670_s4 = inlined_call_operand.vmem [shape: f32[1,128], index: 4, kind: input, shape index: {}]   ;;  %s1671_s5 = inlined_call_operand.hbm [shape: f32[128,128], index: 5, kind: input, shape index: {}]   ;;  %s1672_s6 = inlined_call_operand.vmem [shape: f32[1,128], index: 6, kind: input, shape index: {}]   ;;  %s1673_s7 = inlined_call_operand.hbm [shape: f32[16,128], index: 7, kind: output, shape index: {}, may-alias: {0,7}]  }
   0x1   :  { %14 = vsyncpa [#allocation3 + $0x1], 0 }
   0x2   :  { %15 = vsyncpa [#allocation6], 0 }
   0x3   :  { %16 = vsyncpa [#allocation9], 0 }
   0x4   :  { %17 = vsyncpa [#allocation4], 0 }
   0x5   :  { %19 = vsyncpa [#allocation4 + $0x1], 0  ;;  %s1346_s24 = smov 0   ;;  %s1348_s25 = smov 0  }
   0x6   :  { %s1350_s26 = smov 0   ;;  %s1352_s27 = smov 0  }
   0x7 LB: > { %s1367_s28 = sadd.s32 4294967295, %s1294_s27   ;;  %s769_s29 = sadd.s32 4294967294, %s1294_s27   ;;  %s1294_s27 = sphi %s1352_s27, %s1699_s27   ;;  %s1290_s26 = sphi %s1350_s26, %s1698_s26   ;;  %s1286_s25 = sphi %s1348_s25, %s1697_s25   ;;  %s1282_s24 = sphi %s1346_s24, %s1696_s24  }
   0x8   : > { %p45_p0 = scmp.ne.s32.totalorder %s1286_s25, %s1282_s24  ;;  %p1674_p1 = scmp.eq.s32.totalorder %s1367_s28, 0 }
   0x9   : > { %p201_p3 = scmp.eq.s32.totalorder %s769_s29, 1  ;;  %p770_p5 = scmp.ge.s32.totalorder %s1294_s27, 1 }
   0xa   : > { %p1376_p4 = por %p1674_p1, %p45_p0  ;;  %p208_p7 = scmp.lt.s32.totalorder %s1294_s27, 3 }
   0xb   : > { %p1381_p6 = por %p201_p3, %p45_p0  ;;  %s1296_s10 = smov [#allocation5]  }
   0xc   : > { %s1678_s30 = scalar_select %p1376_p4, 1, 0 }
   0xd   : > { %s1679_s8 = scalar_select %p1381_p6, 1, 0 }
   0xe   : > { %p1386_p8 = pnand %p770_p5, %p208_p7  ;;  %s220_s11 = sshll.u32 %s1296_s10, 4  ;;  %s1390_s11 = int_to_ptr.vmem [resolvable:$true] %s220_s11 }
   0xf   : > { %1680 = sst [smem:[#allocation15_spill]] %s1679_s8  ;;  %s1297_s13 = smov [#allocation7]  }
  0x10   : > { %s1681_s9 = scalar_select %p1386_p8, 1, 0 }
  0x11   : > { %p1034_p9 = pneg %p1386_p8  ;;  %s236_s14 = sshll.u32 %s1297_s13, 4  ;;  %s1401_s14 = int_to_ptr.vmem [resolvable:$true] %s236_s14 }
  0x12   : > { %s1298_s15 = smov [#allocation8]   ;;  %s1106_s19 = scalar_lea.hbm %s1667_s1, 2048 }
  0x13   : > { %p1397_p11 = pnand %p1034_p9, %p1674_p1  ;;  %s1403_s16 = sshll.u32 %s1298_s15, 4  ;;  %s253_s16 = int_to_ptr.vmem [resolvable:$true] %s1403_s16 }
  0x14   : > { %p1107_p12 = scmp.ne.s32.totalorder %s1667_s1, %s1106_s19  ;;  %p1113_p5 = scmp.lt.u32.totalorder %s1106_s19, %s1667_s1 }
  0x15   : > { %p1413_p13 = pneg %p1397_p11 }
  0x17   : > { %p1109_p0 = pnand %p1413_p13, %p1107_p12 }
  0x19   : > { %p1110_p3 = pneg %p1109_p0 }
  0x1b   : > { %p1115_p7 = pnand %p1113_p5, %p1110_p3 }
  0x1d   : > { %1118 = shalt.err (!%p1115_p7)
}
  0x1e   : > { %s1119_s10 = scalar_lea.vmem %s1390_s11, 2048  ;;  %p1127_p2 = scmp.lt.s32.totalorder %s1390_s11, %s1390_s11 }
  0x1f   : > { %p1120_p9 = scmp.ne.s32.totalorder %s1390_s11, %s1119_s10  ;;  %p1128_p6 = scmp.lt.s32.totalorder %s1119_s10, %s1119_s10 }
  0x21   : > { %p1122_p10 = pnand %p1120_p9, %p1413_p13  ;;  %p1129_p12 = por %p1128_p6, %p1127_p2 }
  0x23   : > { %p1123_p1 = pneg %p1122_p10 }
  0x25   : > { %p1130_p0 = pnand %p1129_p12, %p1123_p1 }
  0x27   : > { %1133 = shalt.err (!%p1130_p0)
}
  0x28   : > { %s1299_s13 = smov 128   ;;  %s1300_s15 = smov 8  }
  0x29   : > { %1037 = dma.hbm_to_vmem [thread:$0]  (!%p1397_p11), %s1667_s1, 2048, %s1390_s11, [#allocation6], %s1299_s13, %s1299_s13, %s1300_s15  }
  0x2a   : > { %s1134_s21 = scalar_lea.hbm %s1669_s3, 2048 }
  0x2b   : > { %p1135_p1 = scmp.ne.s32.totalorder %s1669_s3, %s1134_s21  ;;  %p1141_p10 = scmp.lt.u32.totalorder %s1134_s21, %s1669_s3 }
  0x2d   : > { %p1137_p2 = pnand %p1135_p1, %p1413_p13 }
  0x2f   : > { %p1138_p6 = pneg %p1137_p2 }
  0x31   : > { %p1143_p3 = pnand %p1141_p10, %p1138_p6 }
  0x33   : > { %1146 = shalt.err (!%p1143_p3)
}
  0x34   : > { %s1147_s11 = scalar_lea.vmem %s1401_s14, 2048  ;;  %p1155_p12 = scmp.lt.s32.totalorder %s1401_s14, %s1401_s14 }
  0x35   : > { %p1148_p5 = scmp.ne.s32.totalorder %s1401_s14, %s1147_s11  ;;  %p1156_p0 = scmp.lt.s32.totalorder %s1147_s11, %s1147_s11 }
  0x37   : > { %p1150_p7 = pnand %p1148_p5, %p1413_p13  ;;  %p1157_p1 = por %p1156_p0, %p1155_p12 }
  0x39   : > { %p1151_p9 = pneg %p1150_p7 }
  0x3b   : > { %p1158_p2 = pnand %p1157_p1, %p1151_p9 }
  0x3d   : > { %1161 = shalt.err (!%p1158_p2)
}
  0x3e   : > { %1040 = dma.hbm_to_vmem [thread:$0]  (!%p1397_p11), %s1669_s3, 2048, %s1401_s14, [#allocation6], %s1299_s13, %s1299_s13, %s1300_s15  }
  0x3f   : > { %s1162_s20 = scalar_lea.hbm %s1671_s5, 2048 }
  0x40   : > { %p1163_p6 = scmp.ne.s32.totalorder %s1671_s5, %s1162_s20  ;;  %p1169_p5 = scmp.lt.u32.totalorder %s1162_s20, %s1671_s5 }
  0x42   : > { %p1165_p10 = pnand %p1163_p6, %p1413_p13 }
  0x44   : > { %p1166_p3 = pneg %p1165_p10 }
  0x46   : > { %p1171_p7 = pnand %p1169_p5, %p1166_p3 }
  0x48   : > { %1174 = shalt.err (!%p1171_p7)
}
  0x49   : > { %s1175_s11 = scalar_lea.vmem %s253_s16, 2048  ;;  %p1183_p1 = scmp.lt.s32.totalorder %s253_s16, %s253_s16 }
  0x4a   : > { %p1176_p9 = scmp.ne.s32.totalorder %s253_s16, %s1175_s11  ;;  %p1184_p2 = scmp.lt.s32.totalorder %s1175_s11, %s1175_s11 }
  0x4c   : > { %p1178_p12 = pnand %p1176_p9, %p1413_p13  ;;  %p1185_p4 = por %p1184_p2, %p1183_p1 }
  0x4e   : > { %p1179_p0 = pneg %p1178_p12 }
  0x50   : > { %p1186_p8 = pnand %p1185_p4, %p1179_p0 }
  0x52   : > { %1189 = shalt.err (!%p1186_p8)
}
  0x53   : > { %1043 = dma.hbm_to_vmem [thread:$0]  (!%p1397_p11), %s1671_s5, 2048, %s253_s16, [#allocation9], %s1299_s13, %s1299_s13, %s1300_s15  }
  0x54   : > { %s1486_s22 = sadd.s32 1, %s1294_s27   ;;  %s32_s17 = sadd.s32 1, %s1290_s26 }
  0x55   : > { %s29_s12 = ssub.s32 %s1294_s27, %s1486_s22  ;;  %p39_p8 = scmp.ne.s32.totalorder %s1290_s26, %s1286_s25 }
  0x56   : > { %p30_p4 = scmp.eq.s32.totalorder %s29_s12, 0  ;;  %p40_p13 = scmp.eq.s32.totalorder %s1294_s27, 0 }
  0x57   : > { %p1055_p6 = scmp.lt.s32.totalorder %s1294_s27, 2  ;;  %p1684_p3 = scmp.eq.s32.totalorder %s1367_s28, 1 }
  0x58   : > { %s1496_s18 = scalar_select %p30_p4, %s1290_s26, %s32_s17  }
  0x59   : > { %p41_p10 = por %p40_p13, %p39_p8  ;;  %p1500_p5 = por %p1684_p3, %p39_p8 }
  0x5a   : > { %s269_s20 = sand.u32 1, %s1290_s26   ;;  %s776_s21 = sshll.u32 %s1294_s27, 7 }
  0x5b   : > { %s775_s16 = sshll.u32 %s269_s20, 3  ;;  %s1509_s23 = scalar_lea.hbm %s1666_s0, %s776_s21 }
  0x5c   : > { %s273_s29 = scalar_lea.vmem [#allocation2], %s775_s16  ;;  %p1511_p11 = pnand %p1055_p6, %p41_p10 }
  0x5d   : > { %s280_s10 = sshll.u32 %s273_s29, 4  ;;  %s270_s14 = scalar_lea.sflag [#allocation3], %s269_s20  ;;  %s1515_s10 = int_to_ptr.vmem [resolvable:$true] %s280_s10 }
  0x5e   : > { %s1190_s8 = scalar_lea.hbm %s1509_s23, 128  ;;  %p1192_p9 = pneg %p1511_p11 }
  0x5f   : > { %p1191_p7 = scmp.ne.s32.totalorder %s1509_s23, %s1190_s8  ;;  %s1195_s21 = scalar_lea.hbm %s1666_s0, 256 }
  0x60   : > { %p1196_p1 = scmp.lt.u32.totalorder %s1509_s23, %s1666_s0  ;;  %p1197_p2 = scmp.lt.u32.totalorder %s1195_s21, %s1190_s8 }
  0x61   : > { %p1193_p12 = pnand %p1192_p9, %p1191_p7  ;;  %p1199_p8 = scmp.lt.u32.totalorder %s1190_s8, %s1509_s23 }
  0x62   : > { %p1198_p4 = por %p1197_p2, %p1196_p1 }
  0x63   : > { %p1194_p0 = pneg %p1193_p12 }
  0x64   : > { %p1200_p13 = por %p1199_p8, %p1198_p4 }
  0x66   : > { %p1201_p6 = pnand %p1200_p13, %p1194_p0 }
  0x68   : > { %1204 = shalt.err (!%p1201_p6)
}
  0x69   : > { %s1205_s20 = scalar_lea.vmem %s1515_s10, 128  ;;  %s1301_s15 = smov [#allocation2]  }
  0x6a   : > { %p1206_p10 = scmp.ne.s32.totalorder %s1515_s10, %s1205_s20  ;;  %s1210_s29 = sshll.u32 %s1301_s15, 4  ;;  %s1211_s29 = int_to_ptr.vmem [resolvable:$false] %s1210_s29 }
  0x6b   : > { %s1212_s12 = scalar_lea.vmem %s1211_s29, 256  ;;  %p1213_p12 = scmp.lt.s32.totalorder %s1515_s10, %s1211_s29 }
  0x6c   : > { %p1208_p3 = pnand %p1206_p10, %p1192_p9  ;;  %p1214_p1 = scmp.lt.s32.totalorder %s1212_s12, %s1205_s20 }
  0x6e   : > { %p1209_p7 = pneg %p1208_p3  ;;  %p1215_p2 = por %p1214_p1, %p1213_p12 }
  0x70   : > { %p1216_p4 = pnand %p1215_p2, %p1209_p7 }
  0x72   : > { %1219 = shalt.err (!%p1216_p4)
}
  0x73   : > { %1047 = dma.hbm_to_vmem [thread:$0]  (!%p1511_p11), %s1509_s23, 128, %s1515_s10, %s270_s14  }
  0x74   : > { %p1687_p0 = scmp.ne.s32.totalorder %s1681_s9, 0 }
  0x75   : > { %s1545_s8 = sand.u32 (!%p1687_p0), 1, %s1286_s25   ;;  %p1688_p9 = scmp.ne.s32.totalorder (!%p1687_p0), %s1678_s30, 0 }
  0x76   : > { %289 = sbr.rel (%p1687_p0) target bundleno = 1427 (0x593), region = 48  ;;  %s778_s17 = sshll.u32 (!%p1687_p0), %s1545_s8, 3 }
  0x77   : > { %s292_s21 = scalar_lea.sflag (!%p1687_p0), [#allocation3], %s1545_s8  ;;  %s295_s16 = scalar_lea.vmem (!%p1687_p0), [#allocation2], %s778_s17 }
  0x7d   : > { %1265 = dma.done.wait (%p1688_p9), %s292_s21, 128  }
  0x7e   : > { %1267 = vsyncadd (%p1688_p9), %s292_s21, 4294967168  ;;  %p1689_p11 = scmp.eq.s32.totalorder %s1367_s28, 0 }
  0x80   : > { %1269 = dma.done.wait (%p1689_p11), [#allocation6], 4096   ;;  %p1690_p8 = pmov %p1689_p11 }
  0x82   : > { %1271 = vsyncadd (%p1690_p8), [#allocation6], 4294963200  ;;  %p1691_p13 = pmov %p1690_p8 }
  0x83   : > { %p1692_p6 = pmov %p1690_p8 }
  0x84   : > { %1273 = dma.done.wait (%p1691_p13), [#allocation9], 2048  }
  0x85   : > { %1275 = vsyncadd (%p1692_p6), [#allocation9], 4294965248  ;;  %v1563_v0 = vld [vmem:[%s295_s16] sm:$0xff]  ;;  %v356_v1 = vld [vmem:[#allocation5] sm:$0xff]  ;;  %v1302_v4 = vmov 0.0|0.0   ;;  %v343_v14 = vlaneseq  ;;  %vm1303_vm1 = vmmov 0  }
  0x86   : > { %339 = vadd.xlane.f32.xlu0 %v1563_v0  ;;  %v357_v2 = vld [vmem:[#allocation5 + $0x8] sm:$0xff]  ;;  %v358_v3 = vld [vmem:[#allocation5 + $0x10] sm:$0xff]  ;;  %946 = vmatprep.subr.bf16.mxu0 %v1302_v4  ;;  %v359_v6 = vld [vmem:[#allocation5 + $0x18] sm:$0xff]  ;;  %v1304_v29 = vmov 0.0   ;;  %s787_s13 = sshll.u32 %s1367_s28, 7  ;;  %s337_s20 = scalar_lea.vmem [#allocation10], %s778_s17 }
  0x87   : > { %v947_v5 = vpack.c.bf16 %v357_v2, %v356_v1  ;;  %970 = vmatprep.subr.bf16.mxu1 %v1302_v4  ;;  %v950_v7 = vpack.c.bf16 %v359_v6, %v358_v3  ;;  %v360_v8 = vld [vmem:[#allocation5 + $0x20] sm:$0xff]  ;;  %v361_v9 = vld [vmem:[#allocation5 + $0x28] sm:$0xff]  ;;  %v362_v11 = vld [vmem:[#allocation5 + $0x30] sm:$0xff]  ;;  %v1572_v15 = vand.u32 127, %v343_v14  ;;  %873 = vmatprep.mubr.msk.f32.mxu0 %vm1303_vm1, %v1304_v29  ;;  %s670_s15 = sshll.u32 %s337_s20, 4  ;;  %s1622_s21 = scalar_lea.hbm %s1673_s7, %s787_s13  ;;  %s1624_s15 = int_to_ptr.vmem [resolvable:$true] %s670_s15 }
  0x88   : > { %v953_v10 = vpack.c.bf16 %v361_v9, %v360_v8  ;;  %v363_v12 = vld [vmem:[#allocation5 + $0x38] sm:$0xff]  ;;  %v364_v21 = vld [vmem:[#allocation5 + $0x40] sm:$0xff]  ;;  %v365_v22 = vld [vmem:[#allocation5 + $0x48] sm:$0xff]  ;;  %908 = vmatprep.mubr.msk.f32.mxu1 %vm1303_vm1, %v1304_v29  ;;  %s657_s16 = scalar_lea.sflag [#allocation4], %s1545_s8  ;;  %s1220_s28 = scalar_lea.vmem %s1624_s15, 128 }
  0x89   : > { %948 = vmatpush3.bf16.msra.mxu0 %v947_v5  ;;  %v956_v13 = vpack.c.bf16 %v363_v12, %v362_v11  ;;  %vm345_vm0 = vcmp.lt.s32.totalorder %v1572_v15, 32  ;;  %v959_v23 = vpack.c.bf16 %v365_v22, %v364_v21  ;;  %v366_v24 = vld [vmem:[#allocation5 + $0x50] sm:$0xff]  ;;  %v367_v25 = vld [vmem:[#allocation5 + $0x58] sm:$0xff]  ;;  %v368_v27 = vld [vmem:[#allocation5 + $0x60] sm:$0xff]  ;;  %p1221_p10 = scmp.ne.s32.totalorder %s1624_s15, %s1220_s28  ;;  %s1305_s17 = smov [#allocation10]  }
  0x8a   : > { %949 = vmatprep.subr.bf16.mxu0 %v1302_v4  ;;  %v962_v26 = vpack.c.bf16 %v367_v25, %v366_v24  ;;  %v369_v28 = vld [vmem:[#allocation5 + $0x68] sm:$0xff]  ;;  %v370_v31 = vld [vmem:[#allocation5 + $0x70] sm:$0xff]  ;;  %v371_v32 = vld [vmem:[#allocation5 + $0x78] sm:$0xff]  ;;  %s1224_s30 = sshll.u32 %s1305_s17, 4  ;;  %s1225_s30 = int_to_ptr.vmem [resolvable:$false] %s1224_s30 }
  0x8b   : > { %v965_v30 = vpack.c.bf16 %v369_v28, %v368_v27  ;;  %v968_v33 = vpack.c.bf16 %v371_v32, %v370_v31  ;;  %v783_v40 = vld [vmem:[%s1668_s2] ss:$0 sm:$0xff]  ;;  %v463_v44 = vld [vmem:[#allocation7] sm:$0xff]  ;;  %v464_v45 = vld [vmem:[#allocation7 + $0x8] sm:$0xff]  ;;  %p1222_p3 = pnand %p1221_p10, %p1500_p5  ;;  %s1226_s9 = scalar_lea.vmem %s1225_s30, 256 }
  0x8c   : > { %v465_v46 = vld [vmem:[#allocation7 + $0x10] sm:$0xff]  ;;  %v971_v47 = vpack.c.bf16 %v464_v45, %v463_v44  ;;  %v466_v48 = vld [vmem:[#allocation7 + $0x18] sm:$0xff]  ;;  %v467_v50 = vld [vmem:[#allocation7 + $0x20] sm:$0xff]  ;;  %p1227_p12 = scmp.lt.s32.totalorder %s1624_s15, %s1225_s30  ;;  %p1228_p1 = scmp.lt.s32.totalorder %s1226_s9, %s1220_s28 }
  0x8d   : > { %951 = vmatpush3.bf16.msra.mxu0 %v950_v7  ;;  %v974_v49 = vpack.c.bf16 %v466_v48, %v465_v46  ;;  %v468_v51 = vld [vmem:[#allocation7 + $0x28] sm:$0xff]  ;;  %v469_v53 = vld [vmem:[#allocation7 + $0x30] sm:$0xff]  ;;  %v470_v54 = vld [vmem:[#allocation7 + $0x38] sm:$0xff]  ;;  %p1223_p7 = pneg %p1222_p3 }
  0x8e   : > { %952 = vmatprep.subr.bf16.mxu0 %v1302_v4  ;;  %972 = vmatpush3.bf16.msra.mxu1 %v971_v47  ;;  %v977_v52 = vpack.c.bf16 %v468_v51, %v467_v50  ;;  %v980_v55 = vpack.c.bf16 %v470_v54, %v469_v53  ;;  %v471_v61 = vld [vmem:[#allocation7 + $0x40] sm:$0xff]  ;;  %v472_v62 = vld [vmem:[#allocation7 + $0x48] sm:$0xff]  ;;  %v474_v1 = vld [vmem:[#allocation7 + $0x58] sm:$0xff]  ;;  %p1229_p2 = por %p1228_p1, %p1227_p12 }
  0x8f   : > { %973 = vmatprep.subr.bf16.mxu1 %v1302_v4  ;;  %v983_v63 = vpack.c.bf16 %v472_v62, %v471_v61  ;;  %v475_v3 = vld [vmem:[#allocation7 + $0x60] sm:$0xff]  ;;  %v476_v5 = vld [vmem:[#allocation7 + $0x68] sm:$0xff]  ;;  %v477_v7 = vld [vmem:[#allocation7 + $0x70] sm:$0xff] }
  0x90   : > { %v989_v6 = vpack.c.bf16 %v476_v5, %v475_v3  ;;  %v478_v8 = vld [vmem:[#allocation7 + $0x78] sm:$0xff]  ;;  %v562_v11 = vld [vmem:[#allocation8 + $0x8] sm:$0xff]  ;;  %v563_v12 = vld [vmem:[#allocation8 + $0x10] sm:$0xff]  ;;  %p1230_p4 = pnand %p1229_p2, %p1223_p7 }
  0x91   : > { %954 = vmatpush3.bf16.msra.mxu0 %v953_v10  ;;  %v992_v9 = vpack.c.bf16 %v478_v8, %v477_v7  ;;  %v561_v10 = vld [vmem:[#allocation8] sm:$0xff]  ;;  %v564_v14 = vld [vmem:[#allocation8 + $0x18] sm:$0xff]  ;;  %v567_v24 = vld [vmem:[#allocation8 + $0x30] sm:$0xff] }
  0x92   : > { %955 = vmatprep.subr.bf16.mxu0 %v1302_v4  ;;  %975 = vmatpush3.bf16.msra.mxu1 %v974_v49  ;;  %v998_v15 = vpack.c.bf16 %v564_v14, %v563_v12  ;;  %v568_v25 = vld [vmem:[#allocation8 + $0x38] sm:$0xff]  ;;  %v569_v27 = vld [vmem:[#allocation8 + $0x40] sm:$0xff]  ;;  %v570_v28 = vld [vmem:[#allocation8 + $0x48] sm:$0xff] }
  0x93   : > { %976 = vmatprep.subr.bf16.mxu1 %v1302_v4  ;;  %v572_v31 = vld [vmem:[#allocation8 + $0x58] sm:$0xff]  ;;  %v785_v48 = vld [vmem:[%s1672_s6] ss:$0 sm:$0xff] }
  0x95   : > { %957 = vmatpush3.bf16.msra.mxu0 %v956_v13  ;;  %v995_v13 = vpack.c.bf16 %v562_v11, %v561_v10 }
  0x96   : > { %958 = vmatprep.subr.bf16.mxu0 %v1302_v4  ;;  %978 = vmatpush3.bf16.msra.mxu1 %v977_v52 }
  0x97   : > { %979 = vmatprep.subr.bf16.mxu1 %v1302_v4 }
  0x99   : > { %960 = vmatpush3.bf16.msra.mxu0 %v959_v23 }
  0x9a   : > { %961 = vmatprep.subr.bf16.mxu0 %v1302_v4  ;;  %981 = vmatpush3.bf16.msra.mxu1 %v980_v55 }
  0x9b   : > { %982 = vmatprep.subr.bf16.mxu1 %v1302_v4 }
  0x9d   : > { %963 = vmatpush3.bf16.msra.mxu0 %v962_v26  ;;  %v1004_v26 = vpack.c.bf16 %v568_v25, %v567_v24 }
  0x9e   : > { %964 = vmatprep.subr.bf16.mxu0 %v1302_v4  ;;  %984 = vmatpush3.bf16.msra.mxu1 %v983_v63 }
  0x9f   : > { %985 = vmatprep.subr.bf16.mxu1 %v1302_v4 }
  0xa1   : > { %966 = vmatpush3.bf16.msra.mxu0 %v965_v30  ;;  %v571_v30 = vld [vmem:[#allocation8 + $0x50] sm:$0xff] }
  0xa2   : > { %967 = vmatprep.subr.bf16.mxu0 %v1302_v4  ;;  %v1010_v32 = vpack.c.bf16 %v572_v31, %v571_v30 }
  0xa5   : > { %969 = vmatpush3.bf16.msra.mxu0 %v968_v33  ;;  %v573_v33 = vld [vmem:[#allocation8 + $0x60] sm:$0xff] }
  0xa6   : > { %994 = vmatprep.subr.bf16.mxu0 %v1302_v4 }
 0x113   : > { %v340_v16 = vpop.xlane.xlu0 %339 }
 0x114   : > { %v341_v17 = vmul.f32 0.03125, %v340_v16  ;;  %v565_v16 = vld [vmem:[#allocation8 + $0x20] sm:$0xff] }
 0x116   : > { %v342_v18 = vsub.f32 %v1563_v0, %v341_v17  ;;  %v566_v17 = vld [vmem:[#allocation8 + $0x28] sm:$0xff] }
 0x118   : > { %v348_v19 = vsel %vm345_vm0, %v342_v18, 0.0  ;;  %v1001_v18 = vpack.c.bf16 %v566_v17, %v565_v16 }
 0x119   : > { %v349_v20 = vmul.f32 %v348_v19, %v348_v19 }
 0x11b   : > { %350 = vadd.xlane.f32.xlu0 %v349_v20 }
 0x1a8   : > { %v351_v34 = vpop.xlane.xlu0 %350 }
 0x1a9   : > { %v352_v35 = vmul.f32 0.03125, %v351_v34  ;;  %v574_v34 = vld [vmem:[#allocation8 + $0x68] sm:$0xff] }
 0x1ab   : > { %v353_v36 = vadd.f32 1e-05, %v352_v35  ;;  %v1013_v35 = vpack.c.bf16 %v574_v34, %v573_v33 }
 0x1ad   : > { %1100 = vrsqrt.f32 %v353_v36  ;;  %v575_v36 = vld [vmem:[#allocation8 + $0x70] sm:$0xff] }
 0x1b7   : > { %v1101_v37 = vpop.eup %1100 }
 0x1b8   : > { %v355_v38 = vmul.f32 %v1101_v37, %v348_v19  ;;  %v576_v37 = vld [vmem:[#allocation8 + $0x78] sm:$0xff] }
 0x1ba   : > { %874 = vmatmul.mubr.f32.vlgmr.msra.gmra.mrb[0].mxu0 %v355_v38  ;;  %v1016_v38 = vpack.c.bf16 %v576_v37, %v575_v36 }
 0x1bb   : > { %943 = vmatprep.mubr.msk.f32.mxu0 %vm1303_vm1, %v1304_v29  ;;  %996 = vmatpush3.bf16.msra.mxu0 %v995_v13  ;;  %v1007_v29 = vpack.c.bf16 %v570_v28, %v569_v27 }
 0x1bc   : > { %997 = vmatprep.subr.bf16.mxu0 %v1302_v4 }
 0x1bf   : > { %999 = vmatpush3.bf16.msra.mxu0 %v998_v15 }
 0x1c0   : > { %1000 = vmatprep.subr.bf16.mxu0 %v1302_v4 }
 0x1c3   : > { %1002 = vmatpush3.bf16.msra.mxu0 %v1001_v18 }
 0x1c4   : > { %1003 = vmatprep.subr.bf16.mxu0 %v1302_v4 }
 0x1c7   : > { %1005 = vmatpush3.bf16.msra.mxu0 %v1004_v26 }
 0x1c8   : > { %1006 = vmatprep.subr.bf16.mxu0 %v1302_v4 }
 0x1cb   : > { %1008 = vmatpush3.bf16.msra.mxu0 %v1007_v29 }
 0x1cc   : > { %1009 = vmatprep.subr.bf16.mxu0 %v1302_v4 }
 0x1cf   : > { %1011 = vmatpush3.bf16.msra.mxu0 %v1010_v32 }
 0x1d0   : > { %1012 = vmatprep.subr.bf16.mxu0 %v1302_v4 }
 0x1d3   : > { %1014 = vmatpush3.bf16.msra.mxu0 %v1013_v35 }
 0x1d4   : > { %1015 = vmatprep.subr.bf16.mxu0 %v1302_v4 }
 0x1d7   : > { %1017 = vmatpush3.bf16.msra.mxu0 %v1016_v38 }
 0x28d   : > { %v438_v39 = vpop.f32.mrb[0].mxu0 }
 0x28e   : > { %v442_v41 = vadd.f32 %v438_v39, %v1563_v0  ;;  %v875_v42 = vpop.f32.mrb[1].mxu0  ;;  %v473_v0 = vld [vmem:[#allocation7 + $0x50] sm:$0xff] }
 0x28f   : > { %v986_v2 = vpack.c.bf16 %v474_v1, %v473_v0  ;;  %v784_v39 = vld [vmem:[%s1670_s4] ss:$0 sm:$0xff] }
 0x290   : > { %v1589_v43 = vadd.f32 %v783_v40, %v442_v41 }
 0x291   : > { %987 = vmatpush3.bf16.msra.mxu1 %v986_v2 }
 0x292   : > { %451 = vadd.xlane.f32.xlu1 %v1589_v43  ;;  %988 = vmatprep.subr.bf16.mxu1 %v1302_v4 }
 0x295   : > { %990 = vmatpush3.bf16.msra.mxu1 %v989_v6 }
 0x296   : > { %991 = vmatprep.subr.bf16.mxu1 %v1302_v4 }
 0x299   : > { %993 = vmatpush3.bf16.msra.mxu1 %v992_v9 }
 0x31f   : > { %v452_v56 = vpop.xlane.xlu1 %451 }
 0x320   : > { %v453_v57 = vmul.f32 0.03125, %v452_v56 }
 0x322   : > { %v454_v58 = vsub.f32 %v1589_v43, %v453_v57 }
 0x324   : > { %v455_v59 = vsel %vm345_vm0, %v454_v58, 0.0 }
 0x325   : > { %v456_v60 = vmul.f32 %v455_v59, %v455_v59 }
 0x327   : > { %457 = vadd.xlane.f32.xlu1 %v456_v60 }
 0x3b4   : > { %v458_v19 = vpop.xlane.xlu1 %457 }
 0x3b5   : > { %v459_v20 = vmul.f32 0.03125, %v458_v19 }
 0x3b7   : > { %v460_v21 = vadd.f32 1e-05, %v459_v20 }
 0x3b9   : > { %1102 = vrsqrt.f32 %v460_v21 }
 0x3c3   : > { %v1103_v22 = vpop.eup %1102 }
 0x3c4   : > { %v462_v23 = vmul.f32 %v1103_v22, %v455_v59 }
 0x3c6   : > { %909 = vmatmul.mubr.f32.vlgmr.msra.gmra.mrb[0].mxu1 %v462_v23 }
 0x499   : > { %v552_v40 = vpop.f32.mrb[0].mxu1 }
 0x49a   : > { %v553_v41 = vadd.f32 %v784_v39, %v552_v40  ;;  %v910_v42 = vpop.f32.mrb[1].mxu1 }
 0x49c   : > { %v557_v44 = vmul.f32 0.70710677, %v553_v41  ;;  %v556_v46 = vmul.f32 0.5, %v553_v41 }
 0x49e   : > { %1104 = verf.f32 %v557_v44 }
 0x4a8   : > { %v1105_v45 = vpop.eup %1104 }
 0x4a9   : > { %v559_v47 = vadd.f32 1.0, %v1105_v45 }
 0x4ab   : > { %v560_v4 = vmul.f32 %v559_v47, %v556_v46 }
 0x4ad   : > { %944 = vmatmul.mubr.f32.vlgmr.msra.gmra.mrb[2].mxu0 %v560_v4 }
 0x580   : > { %v650_v49 = vpop.f32.mrb[2].mxu0 }
 0x581   : > { %v651_v50 = vadd.f32 %v785_v48, %v650_v49  ;;  %v945_v51 = vpop.f32.mrb[3].mxu0 }
 0x583   : > { %v654_v52 = vadd.f32 %v651_v50, %v1589_v43 }
 0x585   : > { %655 = vst [vmem:[%s337_s20] sm:$0xff] %v654_v52 }
 0x586   : > { %1233 = shalt.err (!%p1230_p4)
}
 0x587   : > { %s1234_s8 = scalar_lea.hbm %s1622_s21, 128  ;;  %s1238_s11 = scalar_lea.hbm %s1673_s7, 256 }
 0x588   : > { %p1235_p0 = scmp.ne.s32.totalorder %s1622_s21, %s1234_s8  ;;  %p1239_p8 = scmp.lt.u32.totalorder %s1622_s21, %s1673_s7 }
 0x589   : > { %p1240_p13 = scmp.lt.u32.totalorder %s1238_s11, %s1234_s8  ;;  %p1242_p10 = scmp.lt.u32.totalorder %s1234_s8, %s1622_s21 }
 0x58a   : > { %p1236_p9 = pnand %p1235_p0, %p1500_p5 }
 0x58b   : > { %p1241_p6 = por %p1240_p13, %p1239_p8 }
 0x58c   : > { %p1237_p11 = pneg %p1236_p9 }
 0x58d   : > { %p1243_p3 = por %p1242_p10, %p1241_p6 }
 0x58f   : > { %p1244_p7 = pnand %p1243_p3, %p1237_p11 }
 0x591   : > { %1247 = shalt.err (!%p1244_p7)
}
 0x592   : > { %1032 = dma.vmem_to_hbm [thread:$0]  (%p1500_p5), %s1624_s15, 128, %s1622_s21, %s657_s16  }
 0x593 PF: > { %s1693_s20 = sld [smem:[#allocation15_spill]]  ;;  %s682_s29 = sand.u32 1, %s1282_s24  }
 0x594   : > { %p1695_p1 = scmp.ge.s32.totalorder %s1294_s27, 2  ;;  %s683_s12 = scalar_lea.sflag [#allocation4], %s682_s29 }
 0x599   : > { %p1694_p12 = scmp.ne.s32.totalorder %s1693_s20, 0 }
 0x59b   : > { %p1049_p2 = pnand %p1695_p1, %p1694_p12 }
 0x59d   : > { %1277 = dma.done.wait (!%p1049_p2), %s683_s12, 128  }
 0x59e   : > { %1279 = vsyncadd (!%p1049_p2), %s683_s12, 4294967168  ;;  %p22_p4 = scmp.ge.s32.totalorder %s1486_s22, 4   ;;  %s1696_s24 = smov %s1286_s25 }
 0x59f   : > { %s1697_s25 = smov %s1290_s26  ;;  %s1698_s26 = smov %s1496_s18 }
 0x5a0   : > { %s1699_s27 = smov %s1486_s22  ;;  %24 = sbr.rel (!%p22_p4) target bundleno = 7 (0x7), region = 105 }
 0x5a7   :  { %688 = vsyncpa [#allocation3], 1 }
 0x5a8   :  { %690 = vsyncpa [#allocation3 + $0x1], 1 }
 0x5a9   :  { %691 = vsyncpa [#allocation6], 1 }
 0x5aa   :  { %692 = vsyncpa [#allocation9], 1 }
 0x5ab   :  { %693 = vsyncpa [#allocation4], 1 }
 0x5ac   :  { %695 = vsyncpa [#allocation4 + $0x1], 1 }

</bundles_post_ra>
